<compile_context>
chip_gen: v7x
topology: tpu7x:2x2x1
jax: 0.10.0
libtpu: 0.0.40
codegen_flags: <defaults>
</compile_context>

<pallas_src>
import functools
import math

import jax
import jax.numpy as jnp
from jax import lax
from jax.experimental import pallas as pl
from jax.experimental.pallas import tpu as pltpu


# ---------------------------------------------------------------------------
# VMEM budgeting (generation aware: v5e/v6e 128 MiB, v7x 64 MiB per core).
# ---------------------------------------------------------------------------
def _vmem_limits():
    cap = 64 * 1024 * 1024           # conservative default if the query fails
    try:
        info = pltpu.get_tpu_info()
        cap = int(getattr(info, "vmem_capacity_bytes", cap) or cap)
    except Exception:
        pass
    limit = int(cap * 0.85)          # explicit scoped-VMEM limit handed to Mosaic
    budget = int(cap * 0.50)         # planner budget for blocks + scratch
    return limit, budget


# ---------------------------------------------------------------------------
# Kernel 1: fused attention branch
#   x3 (B, C, H*W) --[mean over HW, tiled]--> pooled (B, C)
#   att = sigmoid((pooled @ w1t + b1) @ w2t + b2)            -> (B, O)
# ---------------------------------------------------------------------------
def _plan_attention_tiles(B, C, HW, budget):
    """Pick (batch tile, HW tile) so the f32 x block fits the budget."""
    x_budget = max(budget // 2, 1 << 20)
    cands = [d for d in range(128, HW + 1, 128) if HW % d == 0]
    thw = HW
    if cands:
        fitting = [d for d in cands if 2 * B * C * d * 4 <= x_budget]
        thw = max(fitting) if fitting else min(cands)
    tb = B
    while tb % 16 == 0 and 2 * tb * C * thw * 4 > x_budget:
        tb //= 2
    return tb, thw


def odconv_attention(x3, w1t, b1, w2t, b2, *, budget, vmem_limit):
    B, C, HW = x3.shape
    R = w1t.shape[1]
    O = w2t.shape[1]
    TB, THW = _plan_attention_tiles(B, C, HW, budget)
    n_b, n_t = B // TB, HW // THW
    inv_hw = 1.0 / float(HW)

    def kernel(x_ref, w1_ref, b1_ref, w2_ref, b2_ref, o_ref, sum_ref):
        t = pl.program_id(1)

        @pl.when(t == 0)
        def _init():
            sum_ref[...] = jnp.zeros_like(sum_ref)

        # partial sum over this HW tile (lane reduction -> XLU)
        sum_ref[...] = sum_ref[...] + jnp.sum(x_ref[...], axis=2)

        @pl.when(t == pl.num_programs(1) - 1)
        def _finalize():
            pooled = sum_ref[...] * inv_hw                      # (TB, C)
            h = jnp.dot(pooled, w1_ref[...],
                        preferred_element_type=jnp.float32) + b1_ref[...]
            a = jnp.dot(h, w2_ref[...],
                        preferred_element_type=jnp.float32) + b2_ref[...]
            o_ref[...] = jax.nn.sigmoid(a)

    return pl.pallas_call(
        kernel,
        out_shape=jax.ShapeDtypeStruct((B, O), jnp.float32),
        grid=(n_b, n_t),
        in_specs=[
            pl.BlockSpec((TB, C, THW), lambda bb, t: (bb, 0, t)),
            pl.BlockSpec((C, R), lambda bb, t: (0, 0)),
            pl.BlockSpec((1, R), lambda bb, t: (0, 0)),
            pl.BlockSpec((R, O), lambda bb, t: (0, 0)),
            pl.BlockSpec((1, O), lambda bb, t: (0, 0)),
        ],
        out_specs=pl.BlockSpec((TB, O), lambda bb, t: (bb, 0)),
        scratch_shapes=[pltpu.VMEM((TB, C), jnp.float32)],
        compiler_params=pltpu.CompilerParams(
            dimension_semantics=("parallel", "arbitrary"),
            vmem_limit_bytes=vmem_limit),
    )(x3, w1t, b1, w2t, b2)


# ---------------------------------------------------------------------------
# Kernel 2: fused-im2col conv + bias + per-(batch, out-channel) scaling.
#   x_tiles (B, n_rt, C, (TR+K)*Wp_use): padded image split into overlapping
#                                        row tiles, flattened row-major, bf16
#   w_taps  (K*K, C, O): conv weight per tap, bf16 (fully VMEM-resident)
#   bias (O, 1), att (B, O, 1): f32
#   out  (B, O, n_rt*TR*Wp_use): NCHW-flat, f32
# ---------------------------------------------------------------------------
def _plan_conv_tiles(C, O, K, Ho1, Wp, budget, row_tile=None, channel_tile=None):
    """Returns (TR, n_rt, Wp_use, TC, n_tc) for the conv kernel."""
    weight_bytes = 2 * K * K * C * O * 2          # full tensor resident, 2 buffers

    def vmem_cost(tr, wp_u, tc):
        lanes = tr * wp_u
        return (2 * tc * (tr + K) * wp_u * 2      # bf16 x block, double buffered
                + O * lanes * 4                   # f32 accumulator scratch
                + 2 * O * lanes * 4               # f32 output block, double buffered
                + weight_bytes)

    def pick_tc(tr, wp_u):
        if channel_tile is not None:
            tc = int(channel_tile)
            if C % tc == 0 and (tc % 8 == 0 or tc == C):
                return tc
        # prefer the full C (deepest MXU contraction), then large 8-aligned divisors
        cands = [C] + [d for d in (512, 256, 128, 64, 32, 16, 8)
                       if d < C and C % d == 0]
        for tc in cands:
            if vmem_cost(tr, wp_u, tc) <= budget:
                return tc
        return cands[-1]

    # Preferred: a single row block per image (no halo duplication).
    if row_tile is None:
        tc = pick_tc(Ho1, Wp)
        if vmem_cost(Ho1, Wp, tc) <= budget:
            return Ho1, 1, Wp, tc, C // tc

    # Spatially tiled: pad the row pitch to a multiple of 8 so a modest row tile
    # already makes the per-tile lane extent 128-aligned (lane-dense stores).
    wp_u = ((Wp + 7) // 8) * 8
    base = 128 // math.gcd(wp_u, 128)
    if row_tile is not None:
        tr = max(base, (int(row_tile) // base) * base)
    else:
        tr = base
        while tr * 2 < Ho1 and vmem_cost(tr * 2, wp_u, pick_tc(tr * 2, wp_u)) <= budget:
            tr *= 2
    if tr >= Ho1:
        tc = pick_tc(Ho1, Wp)
        return Ho1, 1, Wp, tc, C // tc
    n_rt = -(-Ho1 // tr)
    tc = pick_tc(tr, wp_u)
    return tr, n_rt, wp_u, tc, C // tc


def odconv_conv(x_tiles, w_taps, bias, att, *, K, Wp_use, TR, TC, vmem_limit):
    B, n_rt, C, L_t = x_tiles.shape
    O = w_taps.shape[2]
    n_tc = C // TC
    Np = TR * Wp_use
    # tap (ki, kj) -> flat offset into the padded row-major tile
    taps_off = tuple(ki * Wp_use + kj for ki in range(K) for kj in range(K))

    def kernel(x_ref, w_ref, b_ref, a_ref, o_ref, acc_ref):
        ci = pl.program_id(2)

        @pl.when(ci == 0)
        def _init():
            acc_ref[...] = jnp.zeros_like(acc_ref)

        acc = acc_ref[...]
        for t in range(K * K):
            off = taps_off[t]
            xs = x_ref[0, 0, :, off:off + Np]            # (TC, Np) bf16, static slice
            if n_tc == 1:
                wt = w_ref[t]                            # (C, O) bf16
            else:
                c0 = pl.multiple_of(ci * TC, TC)
                wt = w_ref[t, pl.ds(c0, TC), :]          # (TC, O) bf16
            # (TC,O)^T x (TC,Np) -> (O, Np), f32 accumulation on the MXU
            acc = acc + lax.dot_general(
                wt, xs, (((0,), (0,)), ((), ())),
                preferred_element_type=jnp.float32)
        acc_ref[...] = acc

        @pl.when(ci == n_tc - 1)
        def _finalize():
            res = (acc_ref[...] + b_ref[...]) * a_ref[0]    # (O, Np), bcast (O,1)
            o_ref[0] = res.astype(o_ref.dtype)

    return pl.pallas_call(
        kernel,
        out_shape=jax.ShapeDtypeStruct((B, O, n_rt * Np), jnp.float32),
        grid=(B, n_rt, n_tc),
        in_specs=[
            pl.BlockSpec((1, 1, TC, L_t), lambda b, rt, ci: (b, rt, ci, 0)),
            pl.BlockSpec((K * K, C, O), lambda b, rt, ci: (0, 0, 0)),   # resident
            pl.BlockSpec((O, 1), lambda b, rt, ci: (0, 0)),
            pl.BlockSpec((1, O, 1), lambda b, rt, ci: (b, 0, 0)),
        ],
        out_specs=pl.BlockSpec((1, O, Np), lambda b, rt, ci: (b, 0, rt)),
        scratch_shapes=[pltpu.VMEM((O, Np), jnp.float32)],
        compiler_params=pltpu.CompilerParams(
            dimension_semantics=("parallel", "parallel", "arbitrary"),
            vmem_limit_bytes=vmem_limit),
    )(x_tiles, w_taps, bias, att)


# ---------------------------------------------------------------------------
# Wrapper: ODConv2D forward (x in NCHW, output in NCHW, matching PyTorch)
# ---------------------------------------------------------------------------
def odconv2d_forward(x, params, kernel_size, stride, *,
                     row_tile=None, channel_tile=None):
    B, C, H, W = x.shape
    K = kernel_size
    s = stride
    p = K // 2

    conv_w = params["conv_w"]     # (O, C, K, K)
    conv_b = params["conv_b"]     # (O,)
    fc1_w = params["fc1_w"]       # (R, C)
    fc1_b = params["fc1_b"]       # (R,)
    fc2_w = params["fc2_w"]       # (O, R)
    fc2_b = params["fc2_b"]       # (O,)
    O = conv_w.shape[0]
    R = fc1_w.shape[0]

    vmem_limit, budget = _vmem_limits()

    # --- attention branch (single fused Pallas call) ---
    att = odconv_attention(
        x.reshape(B, C, H * W),
        fc1_w.T.astype(jnp.float32), fc1_b.reshape(1, R).astype(jnp.float32),
        fc2_w.T.astype(jnp.float32), fc2_b.reshape(1, O).astype(jnp.float32),
        budget=budget, vmem_limit=vmem_limit)

    # --- conv hot path: fused im2col via flat tap slices, row-tiled ---
    Hp, Wp = H + 2 * p, W + 2 * p
    Ho1, Wo1 = Hp - K + 1, Wp - K + 1            # stride-1 output extent
    TR, n_rt, Wp_use, TC, _ = _plan_conv_tiles(
        C, O, K, Ho1, Wp, budget, row_tile=row_tile, channel_tile=channel_tile)
    TR_in = TR + K                               # rows per tile incl. halo/absorb row
    Hp_tot = n_rt * TR + K                       # total padded rows

    x_pad = jnp.pad(x.astype(jnp.bfloat16),
                    ((0, 0), (0, 0), (p, Hp_tot - p - H), (p, Wp_use - W - p)))
    if n_rt == 1:
        x_tiles = x_pad.reshape(B, 1, C, Hp_tot * Wp_use)
    else:
        # Overlapping row tiles (halo rows duplicated once in HBM, ~K/TR extra
        # bytes) so every in-kernel tap slice stays a static contiguous slice.
        ridx = jnp.arange(n_rt)[:, None] * TR + jnp.arange(TR_in)[None, :]
        x_tiles = x_pad[:, :, ridx, :]                     # (B, C, n_rt, TR_in, Wp_use)
        x_tiles = x_tiles.transpose(0, 2, 1, 3, 4).reshape(B, n_rt, C, TR_in * Wp_use)

    # (O, C, K, K) -> (K*K, C, O), bf16 (tiny, one-time).
    w_taps = conv_w.transpose(2, 3, 1, 0).reshape(K * K, C, O).astype(jnp.bfloat16)
    bias = conv_b.reshape(O, 1).astype(jnp.float32)
    att3 = att.reshape(B, O, 1)

    out_flat = odconv_conv(x_tiles, w_taps, bias, att3,
                           K=K, Wp_use=Wp_use, TR=TR, TC=TC,
                           vmem_limit=vmem_limit)          # (B, O, n_rt*TR*Wp_use)

    # Already NCHW-flat: reshape and crop the padding rows/columns (no transpose).
    y = out_flat.reshape(B, O, n_rt * TR, Wp_use)[:, :, :Ho1, :Wo1]
    if s > 1:
        # TODO(synk): native strided kernel; for s>1 we subsample the stride-1
        # result (correct, but does s^2 extra work).
        y = y[:, :, ::s, ::s]
    return y


# ---------------------------------------------------------------------------
# Pure-JAX reference for correctness check
# ---------------------------------------------------------------------------
def odconv2d_reference(x, params, kernel_size, stride):
    p = kernel_size // 2
    pooled = x.mean(axis=(2, 3))
    h = pooled @ params["fc1_w"].T + params["fc1_b"]
    a = h @ params["fc2_w"].T + params["fc2_b"]
    att = jax.nn.sigmoid(a)
    conv = lax.conv_general_dilated(
        x, params["conv_w"], window_strides=(stride, stride),
        padding=[(p, p), (p, p)],
        dimension_numbers=("NCHW", "OIHW", "NCHW"))
    conv = conv + params["conv_b"][None, :, None, None]
    return conv * att[:, :, None, None]


if __name__ == "__main__":
    def make_params(key, C, O, R, K):
        ks = jax.random.split(key, 6)
        return {
            "conv_w": 0.1 * jax.random.normal(ks[0], (O, C, K, K), jnp.float32),
            "conv_b": 0.1 * jax.random.normal(ks[1], (O,), jnp.float32),
            "fc1_w": 0.1 * jax.random.normal(ks[2], (R, C), jnp.float32),
            "fc1_b": 0.1 * jax.random.normal(ks[3], (R,), jnp.float32),
            "fc2_w": 0.1 * jax.random.normal(ks[4], (O, R), jnp.float32),
            "fc2_b": 0.1 * jax.random.normal(ks[5], (O,), jnp.float32),
        }

    # (B, C, H, W, O, K, stride, row_tile, channel_tile)
    tests = [
        (2, 4, 16, 16, 8, 3, 1, None, None),   # single row block (n_rt == 1)
        (2, 16, 30, 30, 16, 3, 1, 8, 8),       # forces row tiling (n_rt=4) + channel tiling (n_tc=2)
        (1, 4, 16, 16, 8, 3, 2, None, None),   # strided output, batch of 1
    ]
    for idx, (B, C, H, W, O, K, s, rt, ct) in enumerate(tests):
        kx, kp = jax.random.split(jax.random.fold_in(jax.random.PRNGKey(0), idx))
        x = jax.random.normal(kx, (B, C, H, W), dtype=jnp.float32)
        R = max(C // 4, 4)
        params = make_params(kp, C, O, R, K)

        fwd = jax.jit(functools.partial(odconv2d_forward, kernel_size=K, stride=s,
                                        row_tile=rt, channel_tile=ct))
        out = jax.block_until_ready(fwd(x, params))
        ref = odconv2d_reference(x, params, K, s)
        assert out.shape == ref.shape, (idx, out.shape, ref.shape)
        err = float(jnp.max(jnp.abs(out - ref)))
        # bf16 MXU inputs (f32 accumulation) -> slightly looser tolerance than f32.
        assert jnp.allclose(out, ref, atol=3e-2, rtol=3e-2), \
            f"test {idx}: max|err|={err}"
    print("KERNEL_OK")
</pallas_src>

<mosaic_0001>
module attributes {stable_mosaic.version = 11 : i64} {
  func.func @kernel(%arg0: i32, %arg1: i32, %arg2: memref<2x4x256xf32, #tpu.memory_space<vmem>>, %arg3: memref<4x4xf32, #tpu.memory_space<vmem>>, %arg4: memref<1x4xf32, #tpu.memory_space<vmem>>, %arg5: memref<4x8xf32, #tpu.memory_space<vmem>>, %arg6: memref<1x8xf32, #tpu.memory_space<vmem>>, %arg7: memref<2x8xf32, #tpu.memory_space<vmem>>, %arg8: memref<2x4xf32, #tpu.memory_space<vmem>>) attributes {dimension_semantics = [#tpu.dimension_semantics<parallel>, #tpu.dimension_semantics<arbitrary>], iteration_bounds = array<i64: 1, 1>, scalar_prefetch = 0 : i64, scratch_operands = 1 : i64, tpu.core_type = #tpu.core_type<tc>, window_params = [{transform_indices = @transform_0, window_bounds = array<i64: 2, 4, 256>}, {pipeline_mode = #tpu.pipeline_mode<synchronous>, transform_indices = @transform_1, window_bounds = array<i64: 4, 4>}, {pipeline_mode = #tpu.pipeline_mode<synchronous>, transform_indices = @transform_2, window_bounds = array<i64: 1, 4>}, {pipeline_mode = #tpu.pipeline_mode<synchronous>, transform_indices = @transform_3, window_bounds = array<i64: 4, 8>}, {pipeline_mode = #tpu.pipeline_mode<synchronous>, transform_indices = @transform_4, window_bounds = array<i64: 1, 8>}, {transform_indices = @transform_5, window_bounds = array<i64: 2, 8>}]} {
    %c0_i32 = arith.constant 0 : i32
    %0 = arith.cmpi eq, %arg1, %c0_i32 : i32
    %1 = arith.extui %0 : i1 to i32
    %c0_i32_0 = arith.constant 0 : i32
    %2 = arith.cmpi ne, %1, %c0_i32_0 : i32
    scf.if %2 {
      %cst_9 = arith.constant 0.000000e+00 : f32
      %11 = vector.broadcast %cst_9 : f32 to vector<2x4xf32>
      %c0_10 = arith.constant 0 : index
      %c0_11 = arith.constant 0 : index
      %12 = vector.load %arg8[%c0_10, %c0_11] : memref<2x4xf32, #tpu.memory_space<vmem>>, vector<2x4xf32>
      tpu.vector_store %arg8[%c0_10, %c0_11], %11 {strides = array<i32>} : memref<2x4xf32, #tpu.memory_space<vmem>>, vector<2x4xf32>,
    } else {
    }
    %c0 = arith.constant 0 : index
    %c0_1 = arith.constant 0 : index
    %3 = vector.load %arg8[%c0, %c0_1] : memref<2x4xf32, #tpu.memory_space<vmem>>, vector<2x4xf32>
    %c0_2 = arith.constant 0 : index
    %c0_3 = arith.constant 0 : index
    %c0_4 = arith.constant 0 : index
    %4 = vector.load %arg2[%c0_2, %c0_3, %c0_4] : memref<2x4x256xf32, #tpu.memory_space<vmem>>, vector<2x4x256xf32>
    %cst = arith.constant dense<0.000000e+00> : vector<2x4xf32>
    %5 = vector.multi_reduction <add>, %4, %cst [2] : vector<2x4x256xf32> to vector<2x4xf32>
    %6 = arith.addf %3, %5 : vector<2x4xf32>
    %c0_5 = arith.constant 0 : index
    %c0_6 = arith.constant 0 : index
    %7 = vector.load %arg8[%c0_5, %c0_6] : memref<2x4xf32, #tpu.memory_space<vmem>>, vector<2x4xf32>
    tpu.vector_store %arg8[%c0_5, %c0_6], %6 {strides = array<i32>} : memref<2x4xf32, #tpu.memory_space<vmem>>, vector<2x4xf32>,
    %c0_i32_7 = arith.constant 0 : i32
    %8 = arith.cmpi eq, %arg1, %c0_i32_7 : i32
    %9 = arith.extui %8 : i1 to i32
    %c0_i32_8 = arith.constant 0 : i32
    %10 = arith.cmpi ne, %9, %c0_i32_8 : i32
    scf.if %10 {
      %c0_9 = arith.constant 0 : index
      %c0_10 = arith.constant 0 : index
      %11 = vector.load %arg8[%c0_9, %c0_10] : memref<2x4xf32, #tpu.memory_space<vmem>>, vector<2x4xf32>
      %cst_11 = arith.constant 3.906250e-03 : f32
      %12 = vector.broadcast %cst_11 : f32 to vector<2x4xf32>
      %13 = arith.mulf %11, %12 : vector<2x4xf32>
      %c0_12 = arith.constant 0 : index
      %c0_13 = arith.constant 0 : index
      %14 = vector.load %arg3[%c0_12, %c0_13] : memref<4x4xf32, #tpu.memory_space<vmem>>, vector<4x4xf32>
      %cst_14 = arith.constant dense<0.000000e+00> : vector<2x4xf32>
      %15 = tpu.matmul %13, %14, %cst_14 {dimension_numbers = #tpu.dot_dimension_numbers<[1], [0], [0], [1], [0, 0, 1, 1], [], []>} : vector<2x4xf32>, vector<4x4xf32>, vector<2x4xf32> -> vector<2x4xf32>
      %c0_15 = arith.constant 0 : index
      %c0_16 = arith.constant 0 : index
      %16 = vector.load %arg4[%c0_15, %c0_16] : memref<1x4xf32, #tpu.memory_space<vmem>>, vector<1x4xf32>
      %17 = vector.broadcast %16 : vector<1x4xf32> to vector<2x4xf32>
      %18 = arith.addf %15, %17 : vector<2x4xf32>
      %c0_17 = arith.constant 0 : index
      %c0_18 = arith.constant 0 : index
      %19 = vector.load %arg5[%c0_17, %c0_18] : memref<4x8xf32, #tpu.memory_space<vmem>>, vector<4x8xf32>
      %cst_19 = arith.constant dense<0.000000e+00> : vector<2x8xf32>
      %20 = tpu.matmul %18, %19, %cst_19 {dimension_numbers = #tpu.dot_dimension_numbers<[1], [0], [0], [1], [0, 0, 1, 1], [], []>} : vector<2x4xf32>, vector<4x8xf32>, vector<2x8xf32> -> vector<2x8xf32>
      %c0_20 = arith.constant 0 : index
      %c0_21 = arith.constant 0 : index
      %21 = vector.load %arg6[%c0_20, %c0_21] : memref<1x8xf32, #tpu.memory_space<vmem>>, vector<1x8xf32>
      %22 = vector.broadcast %21 : vector<1x8xf32> to vector<2x8xf32>
      %23 = arith.addf %20, %22 : vector<2x8xf32>
      %24 = arith.negf %23 : vector<2x8xf32>
      %25 = math.exp %24 : vector<2x8xf32>
      %cst_22 = arith.constant 1.000000e+00 : f32
      %26 = vector.broadcast %cst_22 : f32 to vector<2x8xf32>
      %27 = arith.addf %26, %25 : vector<2x8xf32>
      %28 = arith.divf %26, %27 : vector<2x8xf32>
      %c0_23 = arith.constant 0 : index
      %c0_24 = arith.constant 0 : index
      %29 = vector.load %arg7[%c0_23, %c0_24] : memref<2x8xf32, #tpu.memory_space<vmem>>, vector<2x8xf32>
      tpu.vector_store %arg7[%c0_23, %c0_24], %28 {strides = array<i32>} : memref<2x8xf32, #tpu.memory_space<vmem>>, vector<2x8xf32>,
    } else {
    }
    return
  }
  func.func @transform_0(%arg0: i32, %arg1: i32) -> (i32, i32, i32) {
    %c0_i32 = arith.constant 0 : i32
    %c0_i32_0 = arith.constant 0 : i32
    return %arg0, %c0_i32, %arg1 : i32, i32, i32
  }
  func.func @transform_1(%arg0: i32, %arg1: i32) -> (i32, i32) {
    %c0_i32 = arith.constant 0 : i32
    %c0_i32_0 = arith.constant 0 : i32
    %c0_i32_1 = arith.constant 0 : i32
    return %c0_i32, %c0_i32_0 : i32, i32
  }
  func.func @transform_2(%arg0: i32, %arg1: i32) -> (i32, i32) {
    %c0_i32 = arith.constant 0 : i32
    %c0_i32_0 = arith.constant 0 : i32
    %c0_i32_1 = arith.constant 0 : i32
    return %c0_i32, %c0_i32_0 : i32, i32
  }
  func.func @transform_3(%arg0: i32, %arg1: i32) -> (i32, i32) {
    %c0_i32 = arith.constant 0 : i32
    %c0_i32_0 = arith.constant 0 : i32
    %c0_i32_1 = arith.constant 0 : i32
    return %c0_i32, %c0_i32_0 : i32, i32
  }
  func.func @transform_4(%arg0: i32, %arg1: i32) -> (i32, i32) {
    %c0_i32 = arith.constant 0 : i32
    %c0_i32_0 = arith.constant 0 : i32
    %c0_i32_1 = arith.constant 0 : i32
    return %c0_i32, %c0_i32_0 : i32, i32
  }
  func.func @transform_5(%arg0: i32, %arg1: i32) -> (i32, i32) {
    %c0_i32 = arith.constant 0 : i32
    %c0_i32_0 = arith.constant 0 : i32
    return %arg0, %c0_i32 : i32, i32
  }
}

module attributes {stable_mosaic.version = 11 : i64} {
  func.func @kernel(%arg0: i32, %arg1: i32, %arg2: i32, %arg3: memref<1x1x4x342xbf16, #tpu.memory_space<vmem>>, %arg4: memref<9x4x8xbf16, #tpu.memory_space<vmem>>, %arg5: memref<8x1xf32, #tpu.memory_space<vmem>>, %arg6: memref<1x8x1xf32, #tpu.memory_space<vmem>>, %arg7: memref<1x8x288xf32, #tpu.memory_space<vmem>>, %arg8: memref<8x288xf32, #tpu.memory_space<vmem>>) attributes {dimension_semantics = [#tpu.dimension_semantics<parallel>, #tpu.dimension_semantics<parallel>, #tpu.dimension_semantics<arbitrary>], iteration_bounds = array<i64: 2, 1, 1>, scalar_prefetch = 0 : i64, scratch_operands = 1 : i64, tpu.core_type = #tpu.core_type<tc>, window_params = [{transform_indices = @transform_0, window_bounds = array<i64: 1, 1, 4, 342>}, {pipeline_mode = #tpu.pipeline_mode<synchronous>, transform_indices = @transform_1, window_bounds = array<i64: 9, 4, 8>}, {pipeline_mode = #tpu.pipeline_mode<synchronous>, transform_indices = @transform_2, window_bounds = array<i64: 8, 1>}, {transform_indices = @transform_3, window_bounds = array<i64: 1, 8, 1>}, {transform_indices = @transform_4, window_bounds = array<i64: 1, 8, 288>}]} {
    %c0_i32 = arith.constant 0 : i32
    %0 = arith.cmpi eq, %arg2, %c0_i32 : i32
    %1 = arith.extui %0 : i1 to i32
    %c0_i32_0 = arith.constant 0 : i32
    %2 = arith.cmpi ne, %1, %c0_i32_0 : i32
    scf.if %2 {
      %cst_63 = arith.constant 0.000000e+00 : f32
      %62 = vector.broadcast %cst_63 : f32 to vector<8x288xf32>
      %c0_64 = arith.constant 0 : index
      %c0_65 = arith.constant 0 : index
      %63 = vector.load %arg8[%c0_64, %c0_65] : memref<8x288xf32, #tpu.memory_space<vmem>>, vector<8x288xf32>
      tpu.vector_store %arg8[%c0_64, %c0_65], %62 {strides = array<i32>} : memref<8x288xf32, #tpu.memory_space<vmem>>, vector<8x288xf32>,
    } else {
    }
    %c0 = arith.constant 0 : index
    %c0_1 = arith.constant 0 : index
    %3 = vector.load %arg8[%c0, %c0_1] : memref<8x288xf32, #tpu.memory_space<vmem>>, vector<8x288xf32>
    %c0_2 = arith.constant 0 : index
    %c0_3 = arith.constant 0 : index
    %c0_4 = arith.constant 0 : index
    %c0_5 = arith.constant 0 : index
    %4 = vector.load %arg3[%c0_2, %c0_3, %c0_4, %c0_5] : memref<1x1x4x342xbf16, #tpu.memory_space<vmem>>, vector<1x1x4x288xbf16>
    %5 = vector.shape_cast %4 : vector<1x1x4x288xbf16> to vector<4x288xbf16>
    %c0_6 = arith.constant 0 : index
    %c0_7 = arith.constant 0 : index
    %c0_8 = arith.constant 0 : index
    %6 = vector.load %arg4[%c0_6, %c0_7, %c0_8] : memref<9x4x8xbf16, #tpu.memory_space<vmem>>, vector<1x4x8xbf16>
    %7 = vector.shape_cast %6 : vector<1x4x8xbf16> to vector<4x8xbf16>
    %cst = arith.constant dense<0.000000e+00> : vector<8x288xf32>
    %8 = tpu.matmul %7, %5, %cst {dimension_numbers = #tpu.dot_dimension_numbers<[0], [0], [1], [1], [0, 1, 1, 1], [], []>} : vector<4x8xbf16>, vector<4x288xbf16>, vector<8x288xf32> -> vector<8x288xf32>
    %9 = arith.addf %3, %8 : vector<8x288xf32>
    %c0_9 = arith.constant 0 : index
    %c0_10 = arith.constant 0 : index
    %c0_11 = arith.constant 0 : index
    %c1 = arith.constant 1 : index
    %10 = vector.load %arg3[%c0_9, %c0_10, %c0_11, %c1] : memref<1x1x4x342xbf16, #tpu.memory_space<vmem>>, vector<1x1x4x288xbf16>
    %11 = vector.shape_cast %10 : vector<1x1x4x288xbf16> to vector<4x288xbf16>
    %c1_12 = arith.constant 1 : index
    %c0_13 = arith.constant 0 : index
    %c0_14 = arith.constant 0 : index
    %12 = vector.load %arg4[%c1_12, %c0_13, %c0_14] : memref<9x4x8xbf16, #tpu.memory_space<vmem>>, vector<1x4x8xbf16>
    %13 = vector.shape_cast %12 : vector<1x4x8xbf16> to vector<4x8xbf16>
    %cst_15 = arith.constant dense<0.000000e+00> : vector<8x288xf32>
    %14 = tpu.matmul %13, %11, %cst_15 {dimension_numbers = #tpu.dot_dimension_numbers<[0], [0], [1], [1], [0, 1, 1, 1], [], []>} : vector<4x8xbf16>, vector<4x288xbf16>, vector<8x288xf32> -> vector<8x288xf32>
    %15 = arith.addf %9, %14 : vector<8x288xf32>
    %c0_16 = arith.constant 0 : index
    %c0_17 = arith.constant 0 : index
    %c0_18 = arith.constant 0 : index
    %c2 = arith.constant 2 : index
    %16 = vector.load %arg3[%c0_16, %c0_17, %c0_18, %c2] : memref<1x1x4x342xbf16, #tpu.memory_space<vmem>>, vector<1x1x4x288xbf16>
    %17 = vector.shape_cast %16 : vector<1x1x4x288xbf16> to vector<4x288xbf16>
    %c2_19 = arith.constant 2 : index
    %c0_20 = arith.constant 0 : index
    %c0_21 = arith.constant 0 : index
    %18 = vector.load %arg4[%c2_19, %c0_20, %c0_21] : memref<9x4x8xbf16, #tpu.memory_space<vmem>>, vector<1x4x8xbf16>
    %19 = vector.shape_cast %18 : vector<1x4x8xbf16> to vector<4x8xbf16>
    %cst_22 = arith.constant dense<0.000000e+00> : vector<8x288xf32>
    %20 = tpu.matmul %19, %17, %cst_22 {dimension_numbers = #tpu.dot_dimension_numbers<[0], [0], [1], [1], [0, 1, 1, 1], [], []>} : vector<4x8xbf16>, vector<4x288xbf16>, vector<8x288xf32> -> vector<8x288xf32>
    %21 = arith.addf %15, %20 : vector<8x288xf32>
    %c0_23 = arith.constant 0 : index
    %c0_24 = arith.constant 0 : index
    %c0_25 = arith.constant 0 : index
    %c18 = arith.constant 18 : index
    %22 = vector.load %arg3[%c0_23, %c0_24, %c0_25, %c18] : memref<1x1x4x342xbf16, #tpu.memory_space<vmem>>, vector<1x1x4x288xbf16>
    %23 = vector.shape_cast %22 : vector<1x1x4x288xbf16> to vector<4x288xbf16>
    %c3 = arith.constant 3 : index
    %c0_26 = arith.constant 0 : index
    %c0_27 = arith.constant 0 : index
    %24 = vector.load %arg4[%c3, %c0_26, %c0_27] : memref<9x4x8xbf16, #tpu.memory_space<vmem>>, vector<1x4x8xbf16>
    %25 = vector.shape_cast %24 : vector<1x4x8xbf16> to vector<4x8xbf16>
    %cst_28 = arith.constant dense<0.000000e+00> : vector<8x288xf32>
    %26 = tpu.matmul %25, %23, %cst_28 {dimension_numbers = #tpu.dot_dimension_numbers<[0], [0], [1], [1], [0, 1, 1, 1], [], []>} : vector<4x8xbf16>, vector<4x288xbf16>, vector<8x288xf32> -> vector<8x288xf32>
    %27 = arith.addf %21, %26 : vector<8x288xf32>
    %c0_29 = arith.constant 0 : index
    %c0_30 = arith.constant 0 : index
    %c0_31 = arith.constant 0 : index
    %c19 = arith.constant 19 : index
    %28 = vector.load %arg3[%c0_29, %c0_30, %c0_31, %c19] : memref<1x1x4x342xbf16, #tpu.memory_space<vmem>>, vector<1x1x4x288xbf16>
    %29 = vector.shape_cast %28 : vector<1x1x4x288xbf16> to vector<4x288xbf16>
    %c4 = arith.constant 4 : index
    %c0_32 = arith.constant 0 : index
    %c0_33 = arith.constant 0 : index
    %30 = vector.load %arg4[%c4, %c0_32, %c0_33] : memref<9x4x8xbf16, #tpu.memory_space<vmem>>, vector<1x4x8xbf16>
    %31 = vector.shape_cast %30 : vector<1x4x8xbf16> to vector<4x8xbf16>
    %cst_34 = arith.constant dense<0.000000e+00> : vector<8x288xf32>
    %32 = tpu.matmul %31, %29, %cst_34 {dimension_numbers = #tpu.dot_dimension_numbers<[0], [0], [1], [1], [0, 1, 1, 1], [], []>} : vector<4x8xbf16>, vector<4x288xbf16>, vector<8x288xf32> -> vector<8x288xf32>
    %33 = arith.addf %27, %32 : vector<8x288xf32>
    %c0_35 = arith.constant 0 : index
    %c0_36 = arith.constant 0 : index
    %c0_37 = arith.constant 0 : index
    %c20 = arith.constant 20 : index
    %34 = vector.load %arg3[%c0_35, %c0_36, %c0_37, %c20] : memref<1x1x4x342xbf16, #tpu.memory_space<vmem>>, vector<1x1x4x288xbf16>
    %35 = vector.shape_cast %34 : vector<1x1x4x288xbf16> to vector<4x288xbf16>
    %c5 = arith.constant 5 : index
    %c0_38 = arith.constant 0 : index
    %c0_39 = arith.constant 0 : index
    %36 = vector.load %arg4[%c5, %c0_38, %c0_39] : memref<9x4x8xbf16, #tpu.memory_space<vmem>>, vector<1x4x8xbf16>
    %37 = vector.shape_cast %36 : vector<1x4x8xbf16> to vector<4x8xbf16>
    %cst_40 = arith.constant dense<0.000000e+00> : vector<8x288xf32>
    %38 = tpu.matmul %37, %35, %cst_40 {dimension_numbers = #tpu.dot_dimension_numbers<[0], [0], [1], [1], [0, 1, 1, 1], [], []>} : vector<4x8xbf16>, vector<4x288xbf16>, vector<8x288xf32> -> vector<8x288xf32>
    %39 = arith.addf %33, %38 : vector<8x288xf32>
    %c0_41 = arith.constant 0 : index
    %c0_42 = arith.constant 0 : index
    %c0_43 = arith.constant 0 : index
    %c36 = arith.constant 36 : index
    %40 = vector.load %arg3[%c0_41, %c0_42, %c0_43, %c36] : memref<1x1x4x342xbf16, #tpu.memory_space<vmem>>, vector<1x1x4x288xbf16>
    %41 = vector.shape_cast %40 : vector<1x1x4x288xbf16> to vector<4x288xbf16>
    %c6 = arith.constant 6 : index
    %c0_44 = arith.constant 0 : index
    %c0_45 = arith.constant 0 : index
    %42 = vector.load %arg4[%c6, %c0_44, %c0_45] : memref<9x4x8xbf16, #tpu.memory_space<vmem>>, vector<1x4x8xbf16>
    %43 = vector.shape_cast %42 : vector<1x4x8xbf16> to vector<4x8xbf16>
    %cst_46 = arith.constant dense<0.000000e+00> : vector<8x288xf32>
    %44 = tpu.matmul %43, %41, %cst_46 {dimension_numbers = #tpu.dot_dimension_numbers<[0], [0], [1], [1], [0, 1, 1, 1], [], []>} : vector<4x8xbf16>, vector<4x288xbf16>, vector<8x288xf32> -> vector<8x288xf32>
    %45 = arith.addf %39, %44 : vector<8x288xf32>
    %c0_47 = arith.constant 0 : index
    %c0_48 = arith.constant 0 : index
    %c0_49 = arith.constant 0 : index
    %c37 = arith.constant 37 : index
    %46 = vector.load %arg3[%c0_47, %c0_48, %c0_49, %c37] : memref<1x1x4x342xbf16, #tpu.memory_space<vmem>>, vector<1x1x4x288xbf16>
    %47 = vector.shape_cast %46 : vector<1x1x4x288xbf16> to vector<4x288xbf16>
    %c7 = arith.constant 7 : index
    %c0_50 = arith.constant 0 : index
    %c0_51 = arith.constant 0 : index
    %48 = vector.load %arg4[%c7, %c0_50, %c0_51] : memref<9x4x8xbf16, #tpu.memory_space<vmem>>, vector<1x4x8xbf16>
    %49 = vector.shape_cast %48 : vector<1x4x8xbf16> to vector<4x8xbf16>
    %cst_52 = arith.constant dense<0.000000e+00> : vector<8x288xf32>
    %50 = tpu.matmul %49, %47, %cst_52 {dimension_numbers = #tpu.dot_dimension_numbers<[0], [0], [1], [1], [0, 1, 1, 1], [], []>} : vector<4x8xbf16>, vector<4x288xbf16>, vector<8x288xf32> -> vector<8x288xf32>
    %51 = arith.addf %45, %50 : vector<8x288xf32>
    %c0_53 = arith.constant 0 : index
    %c0_54 = arith.constant 0 : index
    %c0_55 = arith.constant 0 : index
    %c38 = arith.constant 38 : index
    %52 = vector.load %arg3[%c0_53, %c0_54, %c0_55, %c38] : memref<1x1x4x342xbf16, #tpu.memory_space<vmem>>, vector<1x1x4x288xbf16>
    %53 = vector.shape_cast %52 : vector<1x1x4x288xbf16> to vector<4x288xbf16>
    %c8 = arith.constant 8 : index
    %c0_56 = arith.constant 0 : index
    %c0_57 = arith.constant 0 : index
    %54 = vector.load %arg4[%c8, %c0_56, %c0_57] : memref<9x4x8xbf16, #tpu.memory_space<vmem>>, vector<1x4x8xbf16>
    %55 = vector.shape_cast %54 : vector<1x4x8xbf16> to vector<4x8xbf16>
    %cst_58 = arith.constant dense<0.000000e+00> : vector<8x288xf32>
    %56 = tpu.matmul %55, %53, %cst_58 {dimension_numbers = #tpu.dot_dimension_numbers<[0], [0], [1], [1], [0, 1, 1, 1], [], []>} : vector<4x8xbf16>, vector<4x288xbf16>, vector<8x288xf32> -> vector<8x288xf32>
    %57 = arith.addf %51, %56 : vector<8x288xf32>
    %c0_59 = arith.constant 0 : index
    %c0_60 = arith.constant 0 : index
    %58 = vector.load %arg8[%c0_59, %c0_60] : memref<8x288xf32, #tpu.memory_space<vmem>>, vector<8x288xf32>
    tpu.vector_store %arg8[%c0_59, %c0_60], %57 {strides = array<i32>} : memref<8x288xf32, #tpu.memory_space<vmem>>, vector<8x288xf32>,
    %c0_i32_61 = arith.constant 0 : i32
    %59 = arith.cmpi eq, %arg2, %c0_i32_61 : i32
    %60 = arith.extui %59 : i1 to i32
    %c0_i32_62 = arith.constant 0 : i32
    %61 = arith.cmpi ne, %60, %c0_i32_62 : i32
    scf.if %61 {
      %c0_63 = arith.constant 0 : index
      %c0_64 = arith.constant 0 : index
      %62 = vector.load %arg8[%c0_63, %c0_64] : memref<8x288xf32, #tpu.memory_space<vmem>>, vector<8x288xf32>
      %c0_65 = arith.constant 0 : index
      %c0_66 = arith.constant 0 : index
      %63 = vector.load %arg5[%c0_65, %c0_66] : memref<8x1xf32, #tpu.memory_space<vmem>>, vector<8x1xf32>
      %64 = vector.broadcast %63 : vector<8x1xf32> to vector<8x288xf32>
      %65 = arith.addf %62, %64 : vector<8x288xf32>
      %c0_67 = arith.constant 0 : index
      %c0_68 = arith.constant 0 : index
      %c0_69 = arith.constant 0 : index
      %66 = vector.load %arg6[%c0_67, %c0_68, %c0_69] : memref<1x8x1xf32, #tpu.memory_space<vmem>>, vector<1x8x1xf32>
      %67 = vector.shape_cast %66 : vector<1x8x1xf32> to vector<8x1xf32>
      %68 = vector.broadcast %67 : vector<8x1xf32> to vector<8x288xf32>
      %69 = arith.mulf %65, %68 : vector<8x288xf32>
      %c0_70 = arith.constant 0 : index
      %c0_71 = arith.constant 0 : index
      %c0_72 = arith.constant 0 : index
      %70 = vector.load %arg7[%c0_70, %c0_71, %c0_72] : memref<1x8x288xf32, #tpu.memory_space<vmem>>, vector<1x8x288xf32>
      %71 = vector.shape_cast %70 : vector<1x8x288xf32> to vector<8x288xf32>
      %72 = vector.shape_cast %69 : vector<8x288xf32> to vector<1x8x288xf32>
      tpu.vector_store %arg7[%c0_70, %c0_71, %c0_72], %72 {strides = array<i32>} : memref<1x8x288xf32, #tpu.memory_space<vmem>>, vector<1x8x288xf32>,
    } else {
    }
    return
  }
  func.func @transform_0(%arg0: i32, %arg1: i32, %arg2: i32) -> (i32, i32, i32, i32) {
    %c0_i32 = arith.constant 0 : i32
    %c0_i32_0 = arith.constant 0 : i32
    return %arg0, %arg1, %arg2, %c0_i32 : i32, i32, i32, i32
  }
  func.func @transform_1(%arg0: i32, %arg1: i32, %arg2: i32) -> (i32, i32, i32) {
    %c0_i32 = arith.constant 0 : i32
    %c0_i32_0 = arith.constant 0 : i32
    %c0_i32_1 = arith.constant 0 : i32
    %c0_i32_2 = arith.constant 0 : i32
    return %c0_i32, %c0_i32_0, %c0_i32_1 : i32, i32, i32
  }
  func.func @transform_2(%arg0: i32, %arg1: i32, %arg2: i32) -> (i32, i32) {
    %c0_i32 = arith.constant 0 : i32
    %c0_i32_0 = arith.constant 0 : i32
    %c0_i32_1 = arith.constant 0 : i32
    return %c0_i32, %c0_i32_0 : i32, i32
  }
  func.func @transform_3(%arg0: i32, %arg1: i32, %arg2: i32) -> (i32, i32, i32) {
    %c0_i32 = arith.constant 0 : i32
    %c0_i32_0 = arith.constant 0 : i32
    %c0_i32_1 = arith.constant 0 : i32
    return %arg0, %c0_i32, %c0_i32_0 : i32, i32, i32
  }
  func.func @transform_4(%arg0: i32, %arg1: i32, %arg2: i32) -> (i32, i32, i32) {
    %c0_i32 = arith.constant 0 : i32
    %c0_i32_0 = arith.constant 0 : i32
    return %arg0, %c0_i32, %arg1 : i32, i32, i32
  }
}

</mosaic_0001>

<bundles_post_ra>
// kernel: odconv2d_forward.2
= control target key start
LH: loop header
LB: loop body
LE: loop exit
PB: predicated region body
PF: predicated region fallthrough
CT: control target
= control target key end

     0   :  { %vm35_vm0 = vcmask 1043456   ;;  %vm24_vm1 = vcmask 25600   ;;  %v279_v10 = vmov 0.0   ;;  %vm280_vm2 = vmmov 0   ;;  %s340_s0 = inlined_call_operand.vmem [shape: f32[2,4,256], index: 0, kind: input, shape index: {}]   ;;  %s341_s1 = inlined_call_operand.vmem [shape: f32[4,4], index: 1, kind: input, shape index: {}]   ;;  %s342_s3 = inlined_call_operand.vmem [shape: f32[4,8], index: 3, kind: input, shape index: {}]   ;;  %s343_s2 = inlined_call_operand.vmem [shape: f32[1,4], index: 2, kind: input, shape index: {}]   ;;  %s344_s4 = inlined_call_operand.vmem [shape: f32[1,8], index: 4, kind: input, shape index: {}]   ;;  %s345_s5 = inlined_call_operand.vmem [shape: f32[2,8], index: 5, kind: output, shape index: {}]  }
   0x1   :  { %v27_v0 = vld [vmem:[%s340_s0] sm:$0xff]  ;;  %v28_v1 = vld [vmem:[%s340_s0 + $0x8] sm:$0xff]  ;;  %25 = vst.msk [vmem:[#allocation2] sm:$0x3] %vm24_vm1, %v279_v10  ;;  %261 = vmatprep.subr.mxu0 %v279_v10  ;;  %266 = vmatprep.subr.mxu1 %v279_v10  ;;  %v48_v12 = vlaneseq  ;;  %vm58_vm3 = vcmask 1041409   ;;  %vm77_vm4 = vcmask 31744  }
   0x2   :  { %v31_v2 = vcombine.high %v27_v0, %v27_v0  ;;  %v36_v3 = vsel %vm35_vm0, %v27_v0, 0.0  ;;  %v32_v4 = vcombine.high %v28_v1, %v28_v1  ;;  %v41_v6 = vsel %vm35_vm0, %v28_v1, 0.0  ;;  %v69_v11 = vld [vmem:[%s341_s1] sm:$0xf]  ;;  %263 = vmatprep.mubr.msk.f32.mxu0 %vm280_vm2, %v279_v10  ;;  %268 = vmatprep.mubr.msk.f32.mxu1 %vm280_vm2, %v279_v10 }
   0x3   :  { %262 = vmatpush3.msk.msra.mxu0 %vm35_vm0, %v69_v11  ;;  %v49_v13 = vand.u32 127, %v48_v12  ;;  %v51_v14 = vshrl.u32 %v48_v12, 7  ;;  %v154_v25 = vld [vmem:[%s342_s3] sm:$0xf]  ;;  %vm244_vm5 = vcmask 58368  }
   0x4   :  { %v37_v5 = vsel %vm35_vm0, %v31_v2, 0.0  ;;  %v42_v7 = vsel %vm35_vm0, %v32_v4, 0.0  ;;  %267 = vmatpush3.msk.msra.mxu1 %vm35_vm0, %v154_v25  ;;  %v250_v26 = vld [vmem:[%s343_s2] ss:$0 sm:$0xff] }
   0x5   :  { %v38_v8 = vadd.f32 %v37_v5, %v36_v3  ;;  %v43_v9 = vadd.f32 %v42_v7, %v41_v6  ;;  %v52_v16 = vsub.s32 %v49_v13, %v51_v14  ;;  %v253_v30 = vld [vmem:[%s344_s4] ss:$0 sm:$0xff] }
   0x7   :  { %39 = vadd.xlane.f32.xlu0 %v38_v8 }
   0x8   :  { %v26_v20 = vld [vmem:[#allocation2] sm:$0x3] }
   0xb   :  { %44 = vadd.xlane.f32.xlu0 %v43_v9 }
  0x94   :  { %v40_v15 = vpop.xlane.xlu0 %39 }
  0x95   :  { %v53_v18 = vrot.slane %v40_v15, %v52_v16 }
  0x98   :  { %v45_v17 = vpop.xlane.xlu0 %44 }
  0x99   :  { %v57_v19 = vrot.slane %v45_v17, %v52_v16 }
  0x9b   :  { %v59_v21 = vsel %vm58_vm3, %v57_v19, %v53_v18 }
  0x9c   :  { %v61_v22 = vadd.f32 %v59_v21, %v26_v20 }
  0x9e   :  { %63 = vst.msk [vmem:[#allocation2] sm:$0x3] %vm24_vm1, %v61_v22 }
  0xa5   :  { %v67_v23 = vld [vmem:[#allocation2] sm:$0x3] }
  0xa6   :  { %v68_v24 = vmul.f32 0.00390625, %v67_v23 }
  0xa8   :  { %264 = vmatmul.mubr.msk.f32.vlgmr.msra.gmra.mrb[0].mxu0 %vm77_vm4, %v68_v24 }
 0x17b   :  { %v150_v27 = vpop.f32.mrb[0].mxu0 }
 0x17c   :  { %v151_v28 = vadd.f32 %v250_v26, %v150_v27  ;;  %v265_v29 = vpop.f32.mrb[1].mxu0 }
 0x17e   :  { %269 = vmatmul.mubr.msk.f32.vlgmr.msra.gmra.mrb[0].mxu1 %vm77_vm4, %v151_v28 }
 0x251   :  { %v234_v31 = vpop.f32.mrb[0].mxu1 }
 0x252   :  { %v235_v32 = vadd.f32 %v253_v30, %v234_v31  ;;  %v270_v33 = vpop.f32.mrb[1].mxu1 }
 0x254   :  { %v256_v34 = vmul.f32 -1.442695, %v235_v32 }
 0x256   :  { %275 = vpow2.f32 %v256_v34 }
 0x260   :  { %v276_v35 = vpop.eup %275 }
 0x261   :  { %v241_v36 = vadd.f32 1.0, %v276_v35 }
 0x263   :  { %277 = vrcp.f32 %v241_v36 }
 0x26d   :  { %v278_v37 = vpop.eup %277 }
 0x26e   :  { %245 = vst.msk [vmem:[%s345_s5] sm:$0x3] %vm244_vm5, %v278_v37 }

// kernel: odconv2d_forward.3
= control target key start
LH: loop header
LB: loop body
LE: loop exit
PB: predicated region body
PF: predicated region fallthrough
CT: control target
= control target key end

     0   :  { %s1982_s15 = smov 0   ;;  %s1984_s16 = smov 0   ;;  %s2193_s0 = inlined_call_operand.vmem [shape: bf16[2,1,4,342], index: 0, kind: input, shape index: {}]   ;;  %s2194_s1 = inlined_call_operand.vmem [shape: bf16[9,4,8], index: 1, kind: input, shape index: {}]   ;;  %s2195_s2 = inlined_call_operand.vmem [shape: f32[8,1], index: 2, kind: input, shape index: {}]   ;;  %s2196_s3 = inlined_call_operand.vmem [shape: f32[2,8,1], index: 3, kind: input, shape index: {}]   ;;  %s2197_s4 = inlined_call_operand.vmem [shape: f32[2,8,288], index: 4, kind: output, shape index: {}]  }
   0x1   :  { %s1986_s17 = smov 0  }
   0x2 LB: > { %s33_s18 = sadd.s32 1, %s1939_s16  ;;  %p1692_p0 = scmp.ge.s32.totalorder %s1943_s17, 1  ;;  %s1943_s17 = sphi %s1986_s17, %s14_s17   ;;  %s1939_s16 = sphi %s1984_s16, %s2199_s16   ;;  %s1935_s15 = sphi %s1982_s15, %s2198_s15  }
   0x3   : > { %p35_p1 = scmp.ge.s32.totalorder %s33_s18, 2  ;;  %p204_p2 = scmp.lt.s32.totalorder %s1943_s17, 3 }
   0x5   : > { %s2201_s18 = smov (%p35_p1, %s33_s18), 0  ;;  %p205_p3 = pnand %p1692_p0, %p204_p2 }
   0x6   : > { %v1699_v0 = vld [vmem:[%s2194_s1 + $0x2] sm:$0x3] (!%p205_p3)  ;;  %p246_p4 = scmp.lt.s32.totalorder (!%p205_p3), %s1935_s15, 1  ;;  %v308_v1 = vlaneseq (!%p205_p3)  ;;  %v1707_v2 = vld [vmem:[%s2194_s1 + $0x6] sm:$0x3] (!%p205_p3)  ;;  %s1946_s27 = smov (!%p205_p3), 127  }
   0x7   : > { %208 = sbr.rel (%p205_p3) target bundleno = 492 (0x1ec), region = 36  ;;  %421 = vxpose.xlu1.c.b16.start.end [1/1] (short) (narrow) (!%p205_p3), %v1699_v0, 16  ;;  %v1945_v3 = vmov (!%p205_p3), 1983009808   ;;  %vm324_vm0 = vcmask (!%p205_p3), 1041408   ;;  %s1947_s28 = smov (!%p205_p3), 126  }
   0x8   : > { %v306_v4 = vunpack.c.l.s4 (!%p205_p3), %v1945_v3  ;;  %v309_v5 = vshrl.u32 (!%p205_p3), %v308_v1, 7  ;;  %v1948_v30 = vmov (!%p205_p3), 0.0   ;;  %v1949_v31 = vmov (!%p205_p3), 0   ;;  %s1951_s29 = smov (!%p205_p3), 110   ;;  %s1952_s30 = smov (!%p205_p3), 108   ;;  %v1556_v3 = vld [vmem:[%s2195_s2] sm:$0xff] (!%p205_p3) }
   0x9   : > { %1751 = vmatprep.subr.bf16.mxu1 (!%p205_p3), %v1948_v30  ;;  %366 = vmatprep.mubr.bf16.mxu0 (!%p205_p3), %v1949_v31  ;;  %vm1950_vm1 = vmmov (!%p205_p3), 0   ;;  %v286_v47 = vld [vmem:[%s2194_s1] sm:$0x3] (!%p205_p3)  ;;  %s1953_s7 = smov (!%p205_p3), 91   ;;  %v1703_v50 = vld [vmem:[%s2194_s1 + $0x4] sm:$0x3] (!%p205_p3) }
   0xa   : > { %v307_v6 = vunpack.c.0.s8 (!%p205_p3), %v306_v4  ;;  %1753 = vmatprep.mubr.msk.bf16.mxu1 (!%p205_p3), %vm1950_vm1, %v1948_v30  ;;  %v1711_v52 = vld [vmem:[%s2194_s1 + $0x8] sm:$0x3] (!%p205_p3)  ;;  %s1954_s12 = smov (!%p205_p3), 109   ;;  %s1955_s13 = smov (!%p205_p3), 92   ;;  %v1715_v59 = vld [vmem:[%s2194_s1 + $0xa] sm:$0x3] (!%p205_p3) }
   0xb   : > { %703 = vxpose.xlu1.c.b16.start.end [1/1] (short) (narrow) (!%p205_p3), %v1707_v2, 16  ;;  %s1956_s20 = smov (!%p205_p3), 90   ;;  %v1723_v61 = vld [vmem:[%s2194_s1 + $0xe] sm:$0x3] (!%p205_p3)  ;;  %v1727_v62 = vld [vmem:[%s2194_s1 + $0x10] sm:$0x3] (!%p205_p3) }
   0xc   : > { %v2014_v7 = vsub.s32 (!%p205_p3), %v307_v6, %v309_v5  ;;  %v1719_v2 = vld [vmem:[%s2194_s1 + $0xc] sm:$0x3] (!%p205_p3)  ;;  %vm460_vm2 = vcmask (!%p205_p3), 1039360   ;;  %vm320_vm3 = vcmask (!%p205_p3), 31744   ;;  %vm601_vm4 = vcmask (!%p205_p3), 1031168  }
   0xd   : > { %vm742_vm5 = vcmask (!%p205_p3), 900096   ;;  %vm883_vm6 = vcmask (!%p205_p3), 891904   ;;  %vm1024_vm7 = vcmask (!%p205_p3), 883712   ;;  %vm1165_vm8 = vcmask (!%p205_p3), 752640  }
   0xe   : > { %s2203_s15 = smov (!%p246_p4, %s1935_s15), 1  ;;  %vm1306_vm9 = vcmask 744448   ;;  %vm1447_vm10 = vcmask 736256   ;;  %vm280_vm11 = vcmask 261120  }
   0xf   : > { %s1872_s23 = smul.u32 6, %s2203_s15  ;;  %281 = vst.msk [vmem:[#allocation2 + $0x10] sm:$0xff] %vm280_vm11, %v1948_v30 }
  0x11   : > { %s2012_s26 = scalar_lea.vmem %s2193_s0, %s1872_s23 }
  0x12   : > { %v418_v8 = vld [vmem:[%s2012_s26] sm:$0x3f] }
  0x13   : > { %v559_v9 = vld [vmem:[%s2012_s26] sm:$0x3f]  ;;  %v445_v10 = vrot.slane %v418_v8, %v2014_v7  ;;  %v438_v11 = vcombine.high %v418_v8, %v418_v8 }
  0x14   : > { %v586_v14 = vrot.slane %v559_v9, %v2014_v7  ;;  %v1123_v15 = vld [vmem:[%s2012_s26] sm:$0x3f]  ;;  %v579_v17 = vcombine.high %v559_v9, %v559_v9 }
  0x15   : > { %454 = vrot.lane.b32.xlu0 %v445_v10, %s1946_s27  ;;  %v453_v12 = vcombine.high %v445_v10, %v445_v10  ;;  %v452_v13 = vrot.slane %v438_v11, %v2014_v7  ;;  %v1405_v16 = vld [vmem:[%s2012_s26] sm:$0x3f]  ;;  %v2024_v18 = vrot.slane %v1123_v15, %v2014_v7  ;;  %v1143_v19 = vcombine.high %v1123_v15, %v1123_v15 }
  0x16   : > { %v2027_v20 = vrot.slane %v1405_v16, %v2014_v7  ;;  %v1425_v21 = vcombine.high %v1405_v16, %v1405_v16  ;;  %v285_v22 = vld [vmem:[%s2012_s26] sm:$0x3f]  ;;  %v594_v23 = vcombine.high %v586_v14, %v586_v14  ;;  %v593_v24 = vrot.slane %v579_v17, %v2014_v7 }
  0x17   : > { %458 = vrot.lane.b32.xlu1 %v452_v13, %s1946_s27  ;;  %v2032_v25 = vrot.slane %v1143_v19, %v2014_v7  ;;  %v311_v27 = vrot.slane %v285_v22, %v2014_v7  ;;  %v304_v28 = vcombine.high %v285_v22, %v285_v22  ;;  %v700_v29 = vld [vmem:[%s2012_s26] sm:$0x3f]  ;;  %v1158_v58 = vcombine.high %v2024_v18, %v2024_v18 }
  0x18   : > { %v2035_v26 = vrot.slane %v1425_v21, %v2014_v7  ;;  %v727_v35 = vrot.slane %v700_v29, %v2014_v7  ;;  %v720_v38 = vcombine.high %v700_v29, %v700_v29  ;;  %v982_v40 = vld [vmem:[%s2012_s26] sm:$0x3f]  ;;  %v1440_v60 = vcombine.high %v2027_v20, %v2027_v20 }
  0x19   : > { %456 = vrot.lane.b32.xlu0 %v453_v12, %s1946_s27  ;;  %v319_v32 = vcombine.high %v311_v27, %v311_v27  ;;  %v326_v33 = vsel %vm324_vm0, %v311_v27, 0  ;;  %v318_v34 = vrot.slane %v304_v28, %v2014_v7  ;;  %v1009_v41 = vrot.slane %v982_v40, %v2014_v7  ;;  %v1264_v45 = vld [vmem:[%s2012_s26] sm:$0x3f] }
  0x1a   : > { %v735_v37 = vcombine.high %v727_v35, %v727_v35  ;;  %v734_v39 = vrot.slane %v720_v38, %v2014_v7  ;;  %v1002_v43 = vcombine.high %v982_v40, %v982_v40  ;;  %v1291_v46 = vrot.slane %v1264_v45, %v2014_v7  ;;  %v841_v53 = vld [vmem:[%s2012_s26] sm:$0x3f] }
  0x1b   : > { %595 = vrot.lane.b32.xlu1 %v586_v14, %s1947_s28  ;;  %1696 = vmatprep.subr.msk.bf16.mxu0 %vm324_vm0, %v319_v32  ;;  %v332_v36 = vsel %vm324_vm0, %v318_v34, 0  ;;  %v1017_v42 = vcombine.high %v1009_v41, %v1009_v41  ;;  %v1284_v49 = vcombine.high %v1264_v45, %v1264_v45  ;;  %v868_v54 = vrot.slane %v841_v53, %v2014_v7 }
  0x1c   : > { %335 = vmatpush1.bf16.msra.mxu0 %v326_v33  ;;  %1752 = vmatpush3.bf16.msra.mxu1 %v332_v36  ;;  %v1016_v44 = vrot.slane %v1002_v43, %v2014_v7  ;;  %v1299_v48 = vcombine.high %v1291_v46, %v1291_v46  ;;  %v861_v56 = vcombine.high %v841_v53, %v841_v53 }
  0x1d   : > { %597 = vrot.lane.b32.xlu0 %v594_v23, %s1947_s28  ;;  %1757 = vmatprep.subr.bf16.mxu1 %v1948_v30  ;;  %v1298_v51 = vrot.slane %v1284_v49, %v2014_v7  ;;  %v876_v55 = vcombine.high %v868_v54, %v868_v54 }
  0x1e   : > { %v875_v57 = vrot.slane %v861_v56, %v2014_v7 }
  0x1f   : > { %599 = vrot.lane.b32.xlu1 %v593_v24, %s1947_s28 }
  0x23   : > { %736 = vrot.lane.b32.xlu1 %v727_v35, %s1951_s29 }
  0x27   : > { %738 = vrot.lane.b32.xlu1 %v735_v37, %s1951_s29 }
  0x2b   : > { %740 = vrot.lane.b32.xlu1 %v734_v39, %s1951_s29  ;;  %s1694_s29 = sshll.u32 %s2203_s15, 3 }
  0x2c   : > { %s262_s6 = scalar_lea.vmem %s2196_s3, %s1694_s29 }
  0x2d   : > { %v1565_v6 = vld [vmem:[%s262_s6] sm:$0xff] }
  0x2f   : > { %1018 = vrot.lane.b32.xlu1 %v1009_v41, %s1952_s30 }
  0x33   : > { %1020 = vrot.lane.b32.xlu1 %v1017_v42, %s1952_s30 }
  0x37   : > { %1022 = vrot.lane.b32.xlu1 %v1016_v44, %s1952_s30 }
  0x3b   : > { %287 = vxpose.xlu0.c.b16.start.end [1/1] (short) (narrow) %v286_v47, 16  ;;  %1300 = vrot.lane.b32.xlu1 %v1291_v46, %s1953_s7 }
  0x3f   : > { %562 = vxpose.xlu0.c.b16.start.end [1/1] (short) (narrow) %v1703_v50, 16  ;;  %1302 = vrot.lane.b32.xlu1 %v1299_v48, %s1953_s7 }
  0x43   : > { %844 = vxpose.xlu0.c.b16.start.end [1/1] (short) (narrow) %v1711_v52, 16  ;;  %1304 = vrot.lane.b32.xlu1 %v1298_v51, %s1953_s7  ;;  %s1873_s7 = smul.u32 24, %s2203_s15 }
  0x45   : > { %s271_s10 = scalar_lea.vmem %s2197_s4, %s1873_s7 }
  0x4c   : > { %877 = vrot.lane.b32.xlu0 %v868_v54, %s1954_s12 }
  0x50   : > { %879 = vrot.lane.b32.xlu0 %v876_v55, %s1954_s12 }
  0x54   : > { %881 = vrot.lane.b32.xlu0 %v875_v57, %s1954_s12 }
  0x58   : > { %1159 = vrot.lane.b32.xlu0 %v2024_v18, %s1955_s13 }
  0x5c   : > { %1161 = vrot.lane.b32.xlu0 %v1158_v58, %s1955_s13 }
  0x60   : > { %1163 = vrot.lane.b32.xlu0 %v2032_v25, %s1955_s13 }
  0x64   : > { %1441 = vrot.lane.b32.xlu0 %v2027_v20, %s1956_s20 }
  0x66   : > { %985 = vxpose.xlu1.c.b16.start.end [1/1] (short) (narrow) %v1715_v59, 16 }
  0x68   : > { %1443 = vrot.lane.b32.xlu0 %v1440_v60, %s1956_s20 }
  0x6a   : > { %1267 = vxpose.xlu1.c.b16.start.end [1/1] (short) (narrow) %v1723_v61, 16 }
  0x6c   : > { %1445 = vrot.lane.b32.xlu0 %v2035_v26, %s1956_s20 }
  0x6d   : > { %v429_v63 = vpop.trf.xlu1 }
  0x6e   : > { %1408 = vxpose.xlu1.c.b16.start.end [1/1] (short) (narrow) %v1727_v62, 16 }
  0x71   : > { %v2086_v0 = vpop.trf.xlu1 }
  0x72   : > { %1910 = vset.pattern.permute.xlu1 %v1949_v31 }
  0x73   : > { %1559 = vperm.xlu1 %1910, %v1556_v3  }
  0x77   : > { %1568 = vperm.xlu1 %1910, %v1565_v6   ;;  %v284_v6 = vld [vmem:[#allocation2 + $0x10] sm:$0xff] }
  0x87   : > { %v455_v1 = vpop.permute.xlu0 %454 }
  0x89   : > { %v459_v4 = vpop.permute.xlu1 %458 }
  0x8a   : > { %1126 = vxpose.xlu0.c.b16.start.end [1/1] (short) (narrow) %v1719_v2, 16  ;;  %v473_v13 = vsel %vm324_vm0, %v459_v4, 0 }
  0x8b   : > { %v457_v5 = vpop.permute.xlu0 %456 }
  0x8c   : > { %v462_v7 = vsel %vm460_vm2, %v457_v5, %v459_v4  ;;  %v461_v12 = vsel %vm460_vm2, %v455_v1, %v457_v5 }
  0x8d   : > { %1700 = vmatprep.subr.msk.bf16.mxu0 %vm324_vm0, %v462_v7  ;;  %v596_v8 = vpop.permute.xlu1 %595  ;;  %v467_v15 = vsel %vm324_vm0, %v461_v12, 0 }
  0x8f   : > { %v598_v10 = vpop.permute.xlu0 %597 }
  0x90   : > { %v602_v19 = vsel %vm601_vm4, %v596_v8, %v598_v10 }
  0x91   : > { %v600_v9 = vpop.permute.xlu1 %599  ;;  %v608_v21 = vsel %vm324_vm0, %v602_v19, 0 }
  0x92   : > { %v603_v16 = vsel %vm601_vm4, %v598_v10, %v600_v9  ;;  %v614_v22 = vsel %vm324_vm0, %v600_v9, 0 }
  0x93   : > { %1911 = vset.pattern.permute.xlu0 %v1949_v31 }
  0x95   : > { %v737_v11 = vpop.permute.xlu1 %736 }
  0x99   : > { %v739_v17 = vpop.permute.xlu1 %738 }
  0x9a   : > { %v743_v24 = vsel %vm742_vm5, %v737_v11, %v739_v17 }
  0x9b   : > { %v749_v27 = vsel %vm324_vm0, %v743_v24, 0 }
  0x9d   : > { %v741_v18 = vpop.permute.xlu1 %740 }
  0x9e   : > { %v744_v20 = vsel %vm742_vm5, %v739_v17, %v741_v18  ;;  %v755_v28 = vsel %vm324_vm0, %v741_v18, 0 }
  0xa1   : > { %v295_v14 = vpop.trf.xlu0  ;;  %v1019_v26 = vpop.permute.xlu1 %1018 }
  0xa2   : > { %1697 = vmatmul.mubr.msk.bf16.vlgmr.msra.gmra.mrb[0].mxu0 %vm320_vm3, %v295_v14  ;;  %1754 = vmatmul.mubr.msk.bf16.vlgmr.msra.gmra.mrb[0].mxu1 %vm320_vm3, %v295_v14 }
  0xa3   : > { %476 = vmatpush1.bf16.msra.mxu0 %v467_v15  ;;  %1758 = vmatpush3.bf16.msra.mxu1 %v473_v13 }
  0xa4   : > { %1704 = vmatprep.subr.msk.bf16.mxu0 %vm324_vm0, %v603_v16  ;;  %507 = vmatprep.mubr.bf16.mxu0 %v1949_v31 }
  0xa5   : > { %1759 = vmatprep.mubr.msk.bf16.mxu1 %vm1950_vm1, %v1948_v30  ;;  %1763 = vmatprep.subr.bf16.mxu1 %v1948_v30  ;;  %v570_v23 = vpop.trf.xlu0  ;;  %v1021_v32 = vpop.permute.xlu1 %1020 }
  0xa6   : > { %v1025_v44 = vsel %vm1024_vm7, %v1019_v26, %v1021_v32 }
  0xa7   : > { %v1031_v46 = vsel %vm324_vm0, %v1025_v44, 0 }
  0xa9   : > { %v852_v25 = vpop.trf.xlu0  ;;  %v1023_v34 = vpop.permute.xlu1 %1022 }
  0xaa   : > { %v1026_v40 = vsel %vm1024_vm7, %v1021_v32, %v1023_v34  ;;  %v1037_v47 = vsel %vm324_vm0, %v1023_v34, 0 }
  0xad   : > { %v1301_v42 = vpop.permute.xlu1 %1300 }
  0xae   : > { %1701 = vmatmul.mubr.msk.bf16.vlgmr.msra.gmra.mrb[0].mxu0 %vm320_vm3, %v429_v63  ;;  %1760 = vmatmul.mubr.msk.bf16.vlgmr.msra.gmra.mrb[0].mxu1 %vm320_vm3, %v429_v63 }
  0xaf   : > { %617 = vmatpush1.bf16.msra.mxu0 %v608_v21  ;;  %1764 = vmatpush3.bf16.msra.mxu1 %v614_v22 }
  0xb0   : > { %1708 = vmatprep.subr.msk.bf16.mxu0 %vm324_vm0, %v744_v20  ;;  %648 = vmatprep.mubr.bf16.mxu0 %v1949_v31 }
  0xb1   : > { %1765 = vmatprep.mubr.msk.bf16.mxu1 %vm1950_vm1, %v1948_v30  ;;  %1769 = vmatprep.subr.bf16.mxu1 %v1948_v30  ;;  %v1303_v45 = vpop.permute.xlu1 %1302 }
  0xb2   : > { %v1307_v59 = vsel %vm1306_vm9, %v1301_v42, %v1303_v45 }
  0xb3   : > { %v1313_v61 = vsel %vm324_vm0, %v1307_v59, 0 }
  0xb5   : > { %v1305_v50 = vpop.permute.xlu1 %1304 }
  0xb6   : > { %v1308_v55 = vsel %vm1306_vm9, %v1303_v45, %v1305_v50  ;;  %v1319_v62 = vsel %vm324_vm0, %v1305_v50, 0 }
  0xba   : > { %1705 = vmatmul.mubr.msk.bf16.vlgmr.msra.gmra.mrb[0].mxu0 %vm320_vm3, %v570_v23  ;;  %1766 = vmatmul.mubr.msk.bf16.vlgmr.msra.gmra.mrb[0].mxu1 %vm320_vm3, %v570_v23 }
  0xbb   : > { %758 = vmatpush1.bf16.msra.mxu0 %v749_v27  ;;  %1770 = vmatpush3.bf16.msra.mxu1 %v755_v28 }
  0xbc   : > { %789 = vmatprep.mubr.bf16.mxu0 %v1949_v31  ;;  %1771 = vmatprep.mubr.msk.bf16.mxu1 %vm1950_vm1, %v1948_v30 }
  0xbd   : > { %1775 = vmatprep.subr.bf16.mxu1 %v1948_v30 }
  0xbe   : > { %v878_v29 = vpop.permute.xlu0 %877 }
  0xc2   : > { %v880_v33 = vpop.permute.xlu0 %879 }
  0xc3   : > { %v884_v35 = vsel %vm883_vm6, %v878_v29, %v880_v33 }
  0xc4   : > { %v890_v39 = vsel %vm324_vm0, %v884_v35, 0 }
  0xc6   : > { %v882_v36 = vpop.permute.xlu0 %881  ;;  %1709 = vmatmul.mubr.msk.bf16.vlgmr.msra.gmra.mrb[0].mxu0 %vm320_vm3, %v2086_v0  ;;  %1772 = vmatmul.mubr.msk.bf16.vlgmr.msra.gmra.mrb[0].mxu1 %vm320_vm3, %v2086_v0 }
  0xc7   : > { %v885_v37 = vsel %vm883_vm6, %v880_v33, %v882_v36  ;;  %v896_v38 = vsel %vm324_vm0, %v882_v36, 0  ;;  %930 = vmatprep.mubr.bf16.mxu0 %v1949_v31  ;;  %1777 = vmatprep.mubr.msk.bf16.mxu1 %vm1950_vm1, %v1948_v30 }
  0xc8   : > { %1712 = vmatprep.subr.msk.bf16.mxu0 %vm324_vm0, %v885_v37  ;;  %1776 = vmatpush3.bf16.msra.mxu1 %v896_v38 }
  0xc9   : > { %899 = vmatpush1.bf16.msra.mxu0 %v890_v39  ;;  %1781 = vmatprep.subr.bf16.mxu1 %v1948_v30 }
  0xca   : > { %v1160_v41 = vpop.permute.xlu0 %1159  ;;  %1716 = vmatprep.subr.msk.bf16.mxu0 %vm324_vm0, %v1026_v40 }
  0xcc   : > { %v993_v52 = vpop.trf.xlu1 }
  0xce   : > { %v1162_v43 = vpop.permute.xlu0 %1161 }
  0xcf   : > { %v1166_v51 = vsel %vm1165_vm8, %v1160_v41, %v1162_v43 }
  0xd0   : > { %v1172_v53 = vsel %vm324_vm0, %v1166_v51, 0  ;;  %v1275_v1 = vpop.trf.xlu1 }
  0xd2   : > { %v1164_v48 = vpop.permute.xlu0 %1163  ;;  %1713 = vmatmul.mubr.msk.bf16.vlgmr.msra.gmra.mrb[0].mxu0 %vm320_vm3, %v852_v25  ;;  %1778 = vmatmul.mubr.msk.bf16.vlgmr.msra.gmra.mrb[0].mxu1 %vm320_vm3, %v852_v25 }
  0xd3   : > { %v1167_v49 = vsel %vm1165_vm8, %v1162_v43, %v1164_v48  ;;  %1040 = vmatpush1.bf16.msra.mxu0 %v1031_v46  ;;  %1782 = vmatpush3.bf16.msra.mxu1 %v1037_v47  ;;  %v1178_v54 = vsel %vm324_vm0, %v1164_v48, 0 }
  0xd4   : > { %1720 = vmatprep.subr.msk.bf16.mxu0 %vm324_vm0, %v1167_v49  ;;  %1071 = vmatprep.mubr.bf16.mxu0 %v1949_v31  ;;  %v1416_v4 = vpop.trf.xlu1 }
  0xd5   : > { %1783 = vmatprep.mubr.msk.bf16.mxu1 %vm1950_vm1, %v1948_v30  ;;  %1787 = vmatprep.subr.bf16.mxu1 %v1948_v30 }
  0xd6   : > { %v1442_v56 = vpop.permute.xlu0 %1441 }
  0xda   : > { %v1444_v57 = vpop.permute.xlu0 %1443 }
  0xdb   : > { %v1448_v0 = vsel %vm1447_vm10, %v1442_v56, %v1444_v57 }
  0xdc   : > { %v1454_v2 = vsel %vm324_vm0, %v1448_v0, 0 }
  0xde   : > { %1717 = vmatmul.mubr.msk.bf16.vlgmr.msra.gmra.mrb[0].mxu0 %vm320_vm3, %v993_v52  ;;  %1784 = vmatmul.mubr.msk.bf16.vlgmr.msra.gmra.mrb[0].mxu1 %vm320_vm3, %v993_v52  ;;  %v1446_v58 = vpop.permute.xlu0 %1445 }
  0xdf   : > { %1181 = vmatpush1.bf16.msra.mxu0 %v1172_v53  ;;  %1788 = vmatpush3.bf16.msra.mxu1 %v1178_v54  ;;  %v1449_v63 = vsel %vm1447_vm10, %v1444_v57, %v1446_v58  ;;  %v1460_v3 = vsel %vm324_vm0, %v1446_v58, 0 }
  0xe0   : > { %1724 = vmatprep.subr.msk.bf16.mxu0 %vm324_vm0, %v1308_v55  ;;  %1212 = vmatprep.mubr.bf16.mxu0 %v1949_v31 }
  0xe1   : > { %1789 = vmatprep.mubr.msk.bf16.mxu1 %vm1950_vm1, %v1948_v30  ;;  %1793 = vmatprep.subr.bf16.mxu1 %v1948_v30 }
  0xf0   : > { %v1134_v60 = vpop.trf.xlu0 }
  0xf1   : > { %1721 = vmatmul.mubr.msk.bf16.vlgmr.msra.gmra.mrb[0].mxu0 %vm320_vm3, %v1134_v60  ;;  %1790 = vmatmul.mubr.msk.bf16.vlgmr.msra.gmra.mrb[0].mxu1 %vm320_vm3, %v1134_v60 }
  0xf2   : > { %1322 = vmatpush1.bf16.msra.mxu0 %v1313_v61  ;;  %1794 = vmatpush3.bf16.msra.mxu1 %v1319_v62  ;;  %v1560_v5 = vpop.permute.xlu1 %1559 }
  0xf3   : > { %1728 = vmatprep.subr.msk.bf16.mxu0 %vm324_vm0, %v1449_v63  ;;  %1353 = vmatprep.mubr.bf16.mxu0 %v1949_v31 }
  0xf4   : > { %1795 = vmatprep.mubr.msk.bf16.mxu1 %vm1950_vm1, %v1948_v30  ;;  %1799 = vmatprep.subr.bf16.mxu1 %v1948_v30 }
  0xf6   : > { %v1569_v7 = vpop.permute.xlu1 %1568 }
  0xfd   : > { %1725 = vmatmul.mubr.msk.bf16.vlgmr.msra.gmra.mrb[0].mxu0 %vm320_vm3, %v1275_v1  ;;  %1796 = vmatmul.mubr.msk.bf16.vlgmr.msra.gmra.mrb[0].mxu1 %vm320_vm3, %v1275_v1 }
  0xfe   : > { %1463 = vmatpush1.bf16.msra.mxu0 %v1454_v2  ;;  %1800 = vmatpush3.bf16.msra.mxu1 %v1460_v3 }
  0xff   : > { %1494 = vmatprep.mubr.bf16.mxu0 %v1949_v31  ;;  %1801 = vmatprep.mubr.msk.bf16.mxu1 %vm1950_vm1, %v1948_v30 }
 0x109   : > { %1729 = vmatmul.mubr.msk.bf16.vlgmr.msra.gmra.mrb[0].mxu0 %vm320_vm3, %v1416_v4  ;;  %1802 = vmatmul.mubr.msk.bf16.vlgmr.msra.gmra.mrb[0].mxu1 %vm320_vm3, %v1416_v4 }
 0x1dc   : > { %v1496_v8 = vpop.f32.mrb[0].mxu0  ;;  %v1537_v9 = vpop.f32.mrb[0].mxu1 }
 0x1dd   : > { %v1807_v10 = vadd.f32 %v1537_v9, %v284_v6  ;;  %v1498_v31 = vpop.f32.mrb[1].mxu0  ;;  %v1803_v11 = vpop.f32.mrb[1].mxu1  ;;  %v1562_v16 = vadd.f32 %v1560_v5, %v1496_v8 }
 0x1de   : > { %v1500_v12 = vpop.f32.mrb[2].mxu0  ;;  %v1540_v13 = vpop.f32.mrb[2].mxu1  ;;  %v1563_v17 = vadd.f32 %v1560_v5, %v1498_v31 }
 0x1df   : > { %1549 = vst.msk [vmem:[#allocation2 + $0x10] sm:$0xff] %vm280_vm11, %v1807_v10  ;;  %v1501_v14 = vpop.f32.mrb[3].mxu0  ;;  %v1804_v15 = vpop.f32.mrb[3].mxu1  ;;  %v1571_v30 = vmul.f32 %v1569_v7, %v1562_v16 }
 0x1e0   : > { %v1572_v18 = vmul.f32 %v1569_v7, %v1563_v17 }
 0x1e1   : > { %1574 = vst [vmem:[%s271_s10] sm:$0xff] %v1571_v30 }
 0x1e2   : > { %1575 = vst [vmem:[%s271_s10 + $0x8] sm:$0xff] %v1572_v18 }
 0x1e6   : > { %v1555_v19 = vld [vmem:[#allocation2 + $0x10] sm:$0xff] }
 0x1e7   : > { %v1564_v20 = vadd.f32 %v1560_v5, %v1555_v19 }
 0x1e9   : > { %v1573_v21 = vmul.f32 %v1569_v7, %v1564_v20 }
 0x1eb   : > { %1576 = vst.msk [vmem:[%s271_s10 + $0x10] sm:$0xff] %vm280_vm11, %v1573_v21 }
 0x1ec PF: > { %s14_s17 = sadd.s32 1, %s1943_s17   ;;  %s2198_s15 = smov %s1939_s16 }
 0x1ed   : > { %p11_p5 = scmp.ge.s32.totalorder %s14_s17, 4   ;;  %s2199_s16 = smov %s2201_s18 }
 0x1ef   :  { %13 = sbr.rel (!%p11_p5) target bundleno = 2 (0x2), region = 85 }

</bundles_post_ra>
